<compile_context>
chip_gen: v6e
topology: v6e:2x2x1
jax: 0.10.0
libtpu: 0.0.40
codegen_flags: <defaults>
</compile_context>

<pallas_src>
import math

import jax
import jax.numpy as jnp
from jax.experimental import pallas as pl
from jax.experimental.pallas import tpu as pltpu


_INV_SQRT2 = 1.0 / math.sqrt(2.0)


def _erf_approx(z):
    # Abramowitz & Stegun 7.1.26, |err| < 1.5e-7 with an exact reciprocal; with the
    # EUP approximate reciprocal the end-to-end gelu deviation vs exact erf stays at
    # the ~1e-3 level, which the review deemed acceptable.
    # TODO(synk): switch to lax.erf if/when Mosaic gains a lowering for erf_p.
    p = 0.3275911
    a1, a2, a3, a4, a5 = (0.254829592, -0.284496736, 1.421413741,
                          -1.453152027, 1.061405429)
    s = jnp.where(z < 0.0, -1.0, 1.0)
    az = jnp.abs(z)
    t = pl.reciprocal(1.0 + p * az, approx=True)      # EUP vrcp, not a VPU divide
    poly = t * (a1 + t * (a2 + t * (a3 + t * (a4 + t * a5))))
    return s * (1.0 - poly * jnp.exp(-az * az))


def bert_intermediate_kernel(x_ref, w_ref, b_ref, o_ref):
    # x_ref: (tm, K)   activation tile, caller's dtype (bf16 stays bf16 on the MXU)
    # w_ref: (K, tn)   weight tile (in x out layout, i.e. PyTorch weight.T)
    # b_ref: (1, tn)   bias tile
    # o_ref: (tm, tn)  output tile (lane-dense: tn is a multiple of 128)
    h = jnp.dot(x_ref[...], w_ref[...], preferred_element_type=jnp.float32)
    h = h + b_ref[...].astype(jnp.float32)
    # exact-erf GELU: h * 0.5 * (1 + erf(h / sqrt(2)))
    o_ref[...] = (h * 0.5 * (1.0 + _erf_approx(h * _INV_SQRT2))).astype(o_ref.dtype)


def _round_up(v, m):
    return (v + m - 1) // m * m


def bert_intermediate_forward(x, w, b, *, tile_m=256, tile_n=None,
                              vmem_budget_bytes=40 << 20):
    """gelu(x @ w + b).

    x: (..., K) activations; w: (K, N) (= PyTorch nn.Linear weight.T); b: (N,).
    Returns (..., N) in x.dtype. No wrapper-side dtype up-casts.
    """
    *lead, k = x.shape
    n = w.shape[1]
    out_dtype = x.dtype

    xm = x.reshape(-1, k)
    m = xm.shape[0]

    x_bytes = xm.dtype.itemsize
    w_bytes = w.dtype.itemsize
    b_bytes = b.dtype.itemsize
    o_bytes = jnp.dtype(out_dtype).itemsize

    # Sublane multiple: 8 for 32-bit, 16 for bf16, 32 for 8-bit dtypes.
    sub = 8 * max(1, 4 // x_bytes)
    tm = min(_round_up(tile_m, sub), _round_up(m, sub))
    mp = _round_up(m, tm)

    # Weight tile: default is the full (lane-padded) N so the weight is DMA'd exactly
    # once; shrink only if the double-buffered working set would exceed the VMEM
    # budget (derived so it also fits v7x's 64 MiB VMEM with headroom).
    if tile_n is None:
        tn = _round_up(n, 128)
        while tn > 128:
            working = 2 * (tm * k * x_bytes + k * tn * w_bytes
                           + tn * b_bytes + tm * tn * o_bytes)
            if working <= vmem_budget_bytes:
                break
            tn = _round_up(tn // 2, 128)
    else:
        tn = min(_round_up(tile_n, 128), _round_up(n, 128))
    np_ = _round_up(n, tn)

    # Pad (padded rows/cols are sliced off after the kernel, so they are inert).
    if mp != m:
        xm = jnp.pad(xm, ((0, mp - m), (0, 0)))
    wp, bp = w, b
    if np_ != n:
        wp = jnp.pad(wp, ((0, 0), (0, np_ - n)))
        bp = jnp.pad(bp, (0, np_ - n))
    bp = bp.reshape(1, np_)

    working = 2 * (tm * k * x_bytes + k * tn * w_bytes
                   + tn * b_bytes + tm * tn * o_bytes)
    vmem_limit = int(min(max(int(1.5 * working) + (2 << 20), 8 << 20), 48 << 20))

    # Grid: N-tiles on the slow (outer) axis, M-tiles inner -> weight/bias block index
    # only changes on the slow axis, so each weight byte is fetched from HBM once.
    # Both axes "parallel" so megacore (v7x, 2 TCs) can shard the M tiles.
    grid = (np_ // tn, mp // tm)
    out = pl.pallas_call(
        bert_intermediate_kernel,
        out_shape=jax.ShapeDtypeStruct((mp, np_), out_dtype),
        grid=grid,
        in_specs=[
            pl.BlockSpec((tm, k), lambda j, i: (i, 0)),   # activations (full K slab)
            pl.BlockSpec((k, tn), lambda j, i: (0, j)),   # weight: changes only on slow axis
            pl.BlockSpec((1, tn), lambda j, i: (0, j)),   # bias:   changes only on slow axis
        ],
        out_specs=pl.BlockSpec((tm, tn), lambda j, i: (i, j)),
        compiler_params=pltpu.CompilerParams(
            dimension_semantics=("parallel", "parallel"),
            vmem_limit_bytes=vmem_limit),
    )(xm, wp, bp)

    # TODO(synk): if this is ever reused with K >~ 4k, add a K grid axis marked
    # "arbitrary" with an f32 VMEM accumulator instead of full-K slabs.
    out = out[:m, :n]
    return out.reshape(*lead, n)


def reference_forward(x, w, b):
    h = jnp.einsum("...k,kn->...n", x.astype(jnp.float32), w.astype(jnp.float32))
    h = h + b.astype(jnp.float32)
    return h * 0.5 * (1.0 + jax.scipy.special.erf(h * _INV_SQRT2))


if __name__ == "__main__":
    # Small shapes consistent with the module: batch=2, seq=8,
    # input_dim=32, intermediate_size=128.
    B, T, D_IN, D_INT = 2, 8, 32, 128
    key = jax.random.PRNGKey(0)
    kx, kw, kb = jax.random.split(key, 3)

    x = jax.random.normal(kx, (B, T, D_IN), dtype=jnp.float32)
    # PyTorch nn.Linear stores weight as (out, in); keep (in, out) so x @ W works.
    w = jax.random.normal(kw, (D_IN, D_INT), dtype=jnp.float32) * 0.1   # dense.weight^T
    b = jax.random.normal(kb, (D_INT,), dtype=jnp.float32) * 0.1        # dense.bias

    ref = reference_forward(x, w, b)

    # f32 path.
    out = jax.block_until_ready(bert_intermediate_forward(x, w, b))
    assert out.shape == (B, T, D_INT)
    # A&S erf + EUP approximate reciprocal -> ~1e-3-level deviation vs exact erf.
    assert jnp.allclose(out, ref, atol=3e-3, rtol=3e-3), "f32 mismatch vs reference"

    # bf16 path (native MXU dtype, bf16 output, no wrapper up-casts).
    out_bf16 = jax.block_until_ready(
        bert_intermediate_forward(x.astype(jnp.bfloat16),
                                  w.astype(jnp.bfloat16),
                                  b.astype(jnp.bfloat16)))
    assert out_bf16.dtype == jnp.bfloat16
    assert jnp.allclose(out_bf16.astype(jnp.float32), ref, atol=3e-2, rtol=3e-2), \
        "bf16 mismatch vs reference"

    print("KERNEL_OK")
</pallas_src>

<mosaic_0001>
module attributes {stable_mosaic.version = 11 : i64} {
  func.func @bert_intermediate_kernel(%arg0: i32, %arg1: i32, %arg2: memref<16x32xf32, #tpu.memory_space<vmem>>, %arg3: memref<32x128xf32, #tpu.memory_space<vmem>>, %arg4: memref<1x128xf32, #tpu.memory_space<vmem>>, %arg5: memref<16x128xf32, #tpu.memory_space<vmem>>) attributes {dimension_semantics = [#tpu.dimension_semantics<parallel>, #tpu.dimension_semantics<parallel>], iteration_bounds = array<i64: 1, 1>, scalar_prefetch = 0 : i64, scratch_operands = 0 : i64, tpu.core_type = #tpu.core_type<tc>, window_params = [{transform_indices = @transform_0, window_bounds = array<i64: 16, 32>}, {transform_indices = @transform_1, window_bounds = array<i64: 32, 128>}, {transform_indices = @transform_2, window_bounds = array<i64: 1, 128>}, {transform_indices = @transform_3, window_bounds = array<i64: 16, 128>}]} {
    %c0 = arith.constant 0 : index
    %c0_0 = arith.constant 0 : index
    %0 = vector.load %arg2[%c0, %c0_0] : memref<16x32xf32, #tpu.memory_space<vmem>>, vector<16x32xf32>
    %c0_1 = arith.constant 0 : index
    %c0_2 = arith.constant 0 : index
    %1 = vector.load %arg3[%c0_1, %c0_2] : memref<32x128xf32, #tpu.memory_space<vmem>>, vector<32x128xf32>
    %cst = arith.constant dense<0.000000e+00> : vector<16x128xf32>
    %2 = tpu.matmul %0, %1, %cst {dimension_numbers = #tpu.dot_dimension_numbers<[1], [0], [0], [1], [0, 0, 1, 1], [], []>} : vector<16x32xf32>, vector<32x128xf32>, vector<16x128xf32> -> vector<16x128xf32>
    %c0_3 = arith.constant 0 : index
    %c0_4 = arith.constant 0 : index
    %3 = vector.load %arg4[%c0_3, %c0_4] : memref<1x128xf32, #tpu.memory_space<vmem>>, vector<1x128xf32>
    %4 = vector.broadcast %3 : vector<1x128xf32> to vector<16x128xf32>
    %5 = arith.addf %2, %4 : vector<16x128xf32>
    %cst_5 = arith.constant 5.000000e-01 : f32
    %6 = vector.broadcast %cst_5 : f32 to vector<16x128xf32>
    %7 = arith.mulf %5, %6 : vector<16x128xf32>
    %cst_6 = arith.constant 0.707106769 : f32
    %8 = vector.broadcast %cst_6 : f32 to vector<16x128xf32>
    %9 = arith.mulf %5, %8 : vector<16x128xf32>
    %cst_7 = arith.constant 0.000000e+00 : f32
    %10 = vector.broadcast %cst_7 : f32 to vector<16x128xf32>
    %11 = arith.cmpf olt, %9, %10 : vector<16x128xf32>
    %cst_8 = arith.constant -1.000000e+00 : f32
    %cst_9 = arith.constant 1.000000e+00 : f32
    %12 = vector.broadcast %cst_8 : f32 to vector<16x128xf32>
    %13 = vector.broadcast %cst_9 : f32 to vector<16x128xf32>
    %14 = arith.select %11, %12, %13 : vector<16x128xi1>, vector<16x128xf32>
    %15 = math.absf %9 : vector<16x128xf32>
    %cst_10 = arith.constant 0.327591091 : f32
    %16 = vector.broadcast %cst_10 : f32 to vector<16x128xf32>
    %17 = arith.mulf %16, %15 : vector<16x128xf32>
    %cst_11 = arith.constant 1.000000e+00 : f32
    %18 = vector.broadcast %cst_11 : f32 to vector<16x128xf32>
    %19 = arith.addf %18, %17 : vector<16x128xf32>
    %20 = tpu.reciprocal %19 {approx = true} : vector<16x128xf32> -> vector<16x128xf32>
    %cst_12 = arith.constant 1.06140542 : f32
    %21 = vector.broadcast %cst_12 : f32 to vector<16x128xf32>
    %22 = arith.mulf %20, %21 : vector<16x128xf32>
    %cst_13 = arith.constant -1.45315206 : f32
    %23 = vector.broadcast %cst_13 : f32 to vector<16x128xf32>
    %24 = arith.addf %23, %22 : vector<16x128xf32>
    %25 = arith.mulf %20, %24 : vector<16x128xf32>
    %cst_14 = arith.constant 1.42141378 : f32
    %26 = vector.broadcast %cst_14 : f32 to vector<16x128xf32>
    %27 = arith.addf %26, %25 : vector<16x128xf32>
    %28 = arith.mulf %20, %27 : vector<16x128xf32>
    %cst_15 = arith.constant -0.284496725 : f32
    %29 = vector.broadcast %cst_15 : f32 to vector<16x128xf32>
    %30 = arith.addf %29, %28 : vector<16x128xf32>
    %31 = arith.mulf %20, %30 : vector<16x128xf32>
    %cst_16 = arith.constant 0.254829586 : f32
    %32 = vector.broadcast %cst_16 : f32 to vector<16x128xf32>
    %33 = arith.addf %32, %31 : vector<16x128xf32>
    %34 = arith.mulf %20, %33 : vector<16x128xf32>
    %cst_17 = arith.constant 0.000000e+00 : f32
    %35 = vector.broadcast %cst_17 : f32 to vector<16x128xf32>
    %36 = arith.subf %35, %15 : vector<16x128xf32>
    %37 = arith.mulf %36, %15 : vector<16x128xf32>
    %38 = math.exp %37 : vector<16x128xf32>
    %39 = arith.mulf %34, %38 : vector<16x128xf32>
    %cst_18 = arith.constant 1.000000e+00 : f32
    %40 = vector.broadcast %cst_18 : f32 to vector<16x128xf32>
    %41 = arith.subf %40, %39 : vector<16x128xf32>
    %42 = arith.mulf %14, %41 : vector<16x128xf32>
    %cst_19 = arith.constant 1.000000e+00 : f32
    %43 = vector.broadcast %cst_19 : f32 to vector<16x128xf32>
    %44 = arith.addf %43, %42 : vector<16x128xf32>
    %45 = arith.mulf %7, %44 : vector<16x128xf32>
    %c0_20 = arith.constant 0 : index
    %c0_21 = arith.constant 0 : index
    %46 = vector.load %arg5[%c0_20, %c0_21] : memref<16x128xf32, #tpu.memory_space<vmem>>, vector<16x128xf32>
    tpu.vector_store %arg5[%c0_20, %c0_21], %45 {strides = array<i32>} : memref<16x128xf32, #tpu.memory_space<vmem>>, vector<16x128xf32>,
    return
  }
  func.func @transform_0(%arg0: i32, %arg1: i32) -> (i32, i32) {
    %c0_i32 = arith.constant 0 : i32
    %c0_i32_0 = arith.constant 0 : i32
    return %arg1, %c0_i32 : i32, i32
  }
  func.func @transform_1(%arg0: i32, %arg1: i32) -> (i32, i32) {
    %c0_i32 = arith.constant 0 : i32
    %c0_i32_0 = arith.constant 0 : i32
    return %c0_i32, %arg0 : i32, i32
  }
  func.func @transform_2(%arg0: i32, %arg1: i32) -> (i32, i32) {
    %c0_i32 = arith.constant 0 : i32
    %c0_i32_0 = arith.constant 0 : i32
    return %c0_i32, %arg0 : i32, i32
  }
  func.func @transform_3(%arg0: i32, %arg1: i32) -> (i32, i32) {
    %c0_i32 = arith.constant 0 : i32
    return %arg1, %arg0 : i32, i32
  }
}

</mosaic_0001>

<bundles_post_ra>
// kernel: tpu_custom_call.1
= control target key start
LH: loop header
LB: loop body
LE: loop exit
PB: predicated region body
PF: predicated region fallthrough
CT: control target
= control target key end

     0   :  { %8 = vsyncpa [#allocation3], 0  ;;  %s359_s0 = inlined_call_operand.hbm [shape: f32[16,32], index: 0, kind: input, shape index: {}]   ;;  %s360_s1 = inlined_call_operand.hbm [shape: f32[32,128], index: 1, kind: input, shape index: {}]   ;;  %s361_s2 = inlined_call_operand.vmem [shape: f32[1,128], index: 2, kind: input, shape index: {}]   ;;  %s362_s3 = inlined_call_operand.hbm [shape: f32[16,128], index: 3, kind: output, shape index: {}]  }
   0x1   :  { %9 = vsyncpa [#allocation6], 0 }
   0x2   :  { %10 = vsyncpa [#allocation4], 0  ;;  %s310_s12 = smov [#allocation2]  }
   0x3   :  { %s16_s13 = sshll.u32 %s310_s12, 4  ;;  %s17_s13 = int_to_ptr.vmem [resolvable:$true] %s16_s13 }
   0x4   :  { %s252_s14 = scalar_lea.vmem %s17_s13, 256  ;;  %p257_p1 = scmp.lt.s32.totalorder %s17_s13, %s17_s13 }
   0x5   :  { %p253_p0 = scmp.ne.s32.totalorder %s17_s13, %s252_s14  ;;  %p258_p2 = scmp.lt.s32.totalorder %s252_s14, %s252_s14 }
   0x7   :  { %p259_p3 = por %p258_p2, %p257_p1 }
   0x9   :  { %p260_p4 = pnand %p259_p3, %p253_p0 }
   0xb   :  { %263 = shalt.err (!%p260_p4)
}
   0xc   :  { %s311_s15 = smov 128   ;;  %s312_s16 = smov 8  }
   0xd   :  { %22 = dma.hbm_to_vmem [thread:$0]  %s359_s0, 256, %s17_s13, [#allocation3], %s311_s15, %s311_s15, %s312_s16  }
   0xe   :  { %s313_s19 = smov [#allocation5]  }
   0xf   :  { %s28_s20 = sshll.u32 %s313_s19, 4  ;;  %s29_s20 = int_to_ptr.vmem [resolvable:$true] %s28_s20 }
  0x10   :  { %s272_s21 = scalar_lea.vmem %s29_s20, 512  ;;  %p277_p6 = scmp.lt.s32.totalorder %s29_s20, %s29_s20 }
  0x11   :  { %p273_p5 = scmp.ne.s32.totalorder %s29_s20, %s272_s21  ;;  %p278_p7 = scmp.lt.s32.totalorder %s272_s21, %s272_s21 }
  0x13   :  { %p279_p8 = por %p278_p7, %p277_p6 }
  0x15   :  { %p280_p9 = pnand %p279_p8, %p273_p5 }
  0x17   :  { %283 = shalt.err (!%p280_p9)
}
  0x18   :  { %34 = dma.hbm_to_vmem [thread:$0]  %s360_s1, 512, %s29_s20, [#allocation6], %s311_s15, %s311_s15, %s312_s16  }
  0x19   :  { %304 = dma.done.wait [#allocation3], 256  }
  0x1a   :  { %305 = vsyncadd [#allocation3], 4294967040 }
  0x1b   :  { %306 = dma.done.wait [#allocation6], 512  }
  0x1c   :  { %307 = vsyncadd [#allocation6], 4294966784  ;;  %vm56_vm0 = vcmask 261120   ;;  %v48_v0 = vld [vmem:[#allocation5 + $0x18] sm:$0xff]  ;;  %v47_v1 = vld [vmem:[#allocation5 + $0x10] sm:$0xff]  ;;  %v314_v49 = vmov 1.0  }
  0x1d   :  { %219 = vmatprep.subr.mxu0 %v48_v0  ;;  %v43_v2 = vld [vmem:[#allocation2] sm:$0xff]  ;;  %v46_v3 = vld [vmem:[#allocation5 + $0x8] sm:$0xff]  ;;  %v45_v4 = vld [vmem:[#allocation5] sm:$0xff] }
  0x1e   :  { %220 = vmatpush3.msra.mxu0 %v48_v0  ;;  %227 = vmatprep.mubr.msk.f32.mxu0 %vm56_vm0, %v43_v2  ;;  %v44_v5 = vld [vmem:[#allocation2 + $0x8] sm:$0xff]  ;;  %v210_v6 = vld [vmem:[%s361_s2] ss:$0 sm:$0xff]  ;;  %s315_s2 = smov [#allocation7]  }
  0x1f   :  { %221 = vmatprep.subr.mxu0 %v47_v1  ;;  %s197_s24 = sshll.u32 %s315_s2, 4  ;;  %s198_s24 = int_to_ptr.vmem [resolvable:$true] %s197_s24 }
  0x20   :  { %222 = vmatpush3.msra.mxu0 %v47_v1  ;;  %s284_s25 = scalar_lea.vmem %s198_s24, 256  ;;  %p289_p11 = scmp.lt.s32.totalorder %s198_s24, %s198_s24 }
  0x21   :  { %223 = vmatprep.subr.mxu0 %v46_v3  ;;  %p285_p10 = scmp.ne.s32.totalorder %s198_s24, %s284_s25  ;;  %p290_p12 = scmp.lt.s32.totalorder %s284_s25, %s284_s25 }
  0x22   :  { %224 = vmatpush3.msra.mxu0 %v46_v3 }
  0x23   :  { %225 = vmatprep.subr.mxu0 %v45_v4  ;;  %p291_p13 = por %p290_p12, %p289_p11 }
  0x24   :  { %226 = vmatpush3.msra.mxu0 %v45_v4 }
  0x25   :  { %228 = vmatmul.mubr.msk.f32.vlgmr.msra.gmra.mxu0 %vm56_vm0, %v44_v5  ;;  %p292_p0 = pnand %p291_p13, %p285_p10 }
  0xe5   :  { %v229_v7 = vpop.f32.mrf.mxu0 }
  0xe6   :  { %v135_v8 = vadd.f32 %v229_v7, %v210_v6 }
  0xe7   :  { %v129_v9 = vpop.f32.mrf.mxu0 }
  0xe8   :  { %v141_v10 = vmul.f32 0.70710677, %v135_v8  ;;  %v130_v11 = vadd.f32 %v210_v6, %v129_v9  ;;  %v139_v54 = vmul.f32 0.5, %v135_v8 }
  0xea   :  { %v147_v12 = vand.u32 2147483647, %v141_v10  ;;  %v140_v13 = vmul.f32 0.70710677, %v130_v11  ;;  %vm143_vm1 = vcmp.lt.f32.partialorder %v141_v10, 0.0  ;;  %v138_v59 = vmul.f32 0.5, %v130_v11 }
  0xeb   :  { %v145_v50 = vsel %vm143_vm1, -1.0, %v314_v49 }
  0xec   :  { %v149_v14 = vmul.f32 0.3275911, %v147_v12  ;;  %v146_v15 = vand.u32 2147483647, %v140_v13  ;;  %v173_v19 = vsub.f32 0.0, %v147_v12  ;;  %vm142_vm2 = vcmp.lt.f32.partialorder %v140_v13, 0.0 }
  0xed   :  { %v144_v56 = vsel %vm142_vm2, -1.0, %v314_v49 }
  0xee   :  { %v151_v16 = vadd.f32 1.0, %v149_v14  ;;  %v148_v17 = vmul.f32 0.3275911, %v146_v15  ;;  %v172_v20 = vsub.f32 0.0, %v146_v15  ;;  %v175_v21 = vmul.f32 %v173_v19, %v147_v12 }
  0xf0   :  { %236 = vrcp.f32 %v151_v16  ;;  %v150_v18 = vadd.f32 1.0, %v148_v17  ;;  %v174_v23 = vmul.f32 %v172_v20, %v146_v15  ;;  %v178_v25 = vmul.f32 1.442695, %v175_v21 }
  0xf2   :  { %238 = vrcp.f32 %v150_v18  ;;  %v176_v29 = vmul.f32 1.442695, %v174_v23 }
  0xf3   :  { %240 = vpow2.f32 %v178_v25 }
  0xf4   :  { %242 = vpow2.f32 %v176_v29 }
  0xfd   :  { %v237_v22 = vpop.eup %236 }
  0xfe   :  { %v155_v24 = vmul.f32 1.0614054, %v237_v22 }
  0xff   :  { %v239_v26 = vpop.eup %238 }
 0x100   :  { %v157_v27 = vadd.f32 -1.4531521, %v155_v24  ;;  %v154_v28 = vmul.f32 1.0614054, %v239_v26  ;;  %v241_v43 = vpop.eup %240 }
 0x101   :  { %v243_v47 = vpop.eup %242 }
 0x102   :  { %v159_v30 = vmul.f32 %v237_v22, %v157_v27  ;;  %v156_v31 = vadd.f32 -1.4531521, %v154_v28 }
 0x104   :  { %v161_v32 = vadd.f32 1.4214138, %v159_v30  ;;  %v158_v33 = vmul.f32 %v239_v26, %v156_v31 }
 0x106   :  { %v163_v34 = vmul.f32 %v237_v22, %v161_v32  ;;  %v160_v35 = vadd.f32 1.4214138, %v158_v33 }
 0x108   :  { %v165_v36 = vadd.f32 -0.28449672, %v163_v34  ;;  %v162_v37 = vmul.f32 %v239_v26, %v160_v35 }
 0x10a   :  { %v167_v38 = vmul.f32 %v237_v22, %v165_v36  ;;  %v164_v39 = vadd.f32 -0.28449672, %v162_v37 }
 0x10c   :  { %v169_v40 = vadd.f32 0.2548296, %v167_v38  ;;  %v166_v41 = vmul.f32 %v239_v26, %v164_v39 }
 0x10e   :  { %v171_v42 = vmul.f32 %v237_v22, %v169_v40  ;;  %v168_v44 = vadd.f32 0.2548296, %v166_v41 }
 0x110   :  { %v181_v45 = vmul.f32 %v241_v43, %v171_v42  ;;  %v170_v46 = vmul.f32 %v239_v26, %v168_v44 }
 0x112   :  { %v183_v48 = vsub.f32 1.0, %v181_v45  ;;  %v180_v51 = vmul.f32 %v243_v47, %v170_v46 }
 0x114   :  { %v185_v52 = vmul.f32 %v183_v48, %v145_v50  ;;  %v182_v53 = vsub.f32 1.0, %v180_v51 }
 0x116   :  { %v187_v55 = vadd.f32 1.0, %v185_v52  ;;  %v184_v57 = vmul.f32 %v182_v53, %v144_v56 }
 0x118   :  { %v189_v58 = vmul.f32 %v187_v55, %v139_v54  ;;  %v186_v60 = vadd.f32 1.0, %v184_v57 }
 0x11a   :  { %191 = vst [vmem:[#allocation7 + $0x8] sm:$0xff] %v189_v58  ;;  %v188_v61 = vmul.f32 %v186_v60, %v138_v59 }
 0x11c   :  { %190 = vst [vmem:[#allocation7] sm:$0xff] %v188_v61 }
 0x11d   :  { %295 = shalt.err (!%p292_p0)
}
 0x11e   :  { %203 = dma.vmem_to_hbm [thread:$0]  %s198_s24, 256, %s362_s3, [#allocation4], %s311_s15, %s311_s15, %s312_s16  }
 0x11f   :  { %308 = dma.done.wait [#allocation4], 256  }
 0x120   :  { %309 = vsyncadd [#allocation4], 4294967040 }
 0x121   :  { %207 = vsyncpa [#allocation3], 1 }
 0x122   :  { %208 = vsyncpa [#allocation6], 1 }
 0x123   :  { %209 = vsyncpa [#allocation4], 1 }

</bundles_post_ra>
